<compile_context>
chip_gen: v7x
topology: tpu7x:2x2x1
jax: 0.10.0
libtpu: 0.0.40
codegen_flags: <defaults>
</compile_context>

<pallas_src>
import numpy as np
import jax
import jax.numpy as jnp
from jax.experimental import pallas as pl
from jax.experimental.pallas import tpu as pltpu


def _gridmask_kernel(x_ref, m_ref, o_ref):
    # m_ref is a (1, LT) slab of the keep-mask in x's dtype; it broadcasts
    # over the row (sublane) axis of the x tile.  Pure VPU multiply; the
    # kernel is HBM-streaming bound, so nothing else belongs in the body.
    o_ref[...] = x_ref[...] * m_ref[...]


# ----------------------------------------------------------------------------
# Host-side GridMask parameter sampling + mask construction (PyTorch parity).
# ----------------------------------------------------------------------------
def sample_gridmask_params(rng, h, ratio=0.5, prob=0.7, training=True):
    """Host-side randomness; mirrors GridMask.forward exactly."""
    if rng.rand() > prob or not training:
        return None
    d = int(rng.randint(2, h))
    l = min(max(int(d * ratio + 0.5), 1), d - 1)
    st_h = int(rng.randint(d))
    st_w = int(rng.randint(d))
    return dict(d=d, l=l, st_h=st_h, st_w=st_w)


def gridmask_keep_mask_np(h, w, d, l, st_h, st_w):
    """Verbatim numpy port of the PyTorch mask loops; returns the KEEP mask
    (the module does `mask = 1 - mask` before multiplying)."""
    hh, ww = int(1.5 * h), int(1.5 * w)
    mask = np.ones((hh, ww), np.uint8)
    for i in range(hh // d):
        s = d * i + st_h
        t = min(s + l, hh)
        mask[s:t, :] = 0
    for i in range(ww // d):
        s = d * i + st_w
        t = min(s + l, ww)
        mask[:, s:t] = 0
    mask = mask[(hh - h) // 2:(hh - h) // 2 + h,
                (ww - w) // 2:(ww - w) // 2 + w]
    return (1 - mask).astype(np.float32)


# ----------------------------------------------------------------------------
# Generation-aware tiling.
# ----------------------------------------------------------------------------
def _chip_budget():
    """Return (target_block_bytes, vmem_limit_bytes, num_tensorcores)."""
    vmem_cap = None
    try:
        vmem_cap = int(pltpu.get_tpu_info().vmem_capacity_bytes)
    except Exception:
        try:
            kind = jax.devices()[0].device_kind.lower()
            vmem_cap = (64 << 20) if "v7" in kind else (128 << 20)
        except Exception:
            vmem_cap = 64 << 20  # conservative default
    if vmem_cap <= (64 << 20):
        # v7x-class: 64 MiB VMEM, ~3.2 TB/s HBM, 2 TensorCores per chip.
        # Bigger blocks amortize the ~0.35 us/step overhead against fast HBM;
        # 48 MiB scoped limit leaves headroom for 4x block double buffering.
        return 6 << 20, 48 << 20, 2
    # v5e / v6e: 128 MiB physical VMEM, single TensorCore.  4 MiB blocks are
    # already ~roofline; 64 MiB limit raises v5e's 16 MiB default scope.
    return 4 << 20, 64 << 20, 1


def _choose_tiles(rows, hw, itemsize, target_bytes, num_tc):
    """Pick (row_tile, lane_tile) for a (rows, hw) elementwise stream.

    Lane tile is the full H*W (fully lane-dense) when a minimal 8-row block
    fits the byte target; otherwise it is a multiple of 128 sized so one
    block ~= target_bytes.  Row tile is a multiple of 8 (or the full row
    count) chosen to fill the target.  On 2-TC chips the grid is split to at
    least two (preferably an even number of) steps so both cores get work.
    """
    # --- lane (last-dim) tile -------------------------------------------------
    if hw <= 128 or 8 * hw * itemsize <= target_bytes:
        lt = hw                                   # full extent, no lane tiling
    else:
        lt = max(128, (target_bytes // (8 * itemsize)) // 128 * 128)

    # --- row (second-to-last dim) tile ---------------------------------------
    if rows <= 8:
        bt = rows                                 # full extent
    else:
        bt = target_bytes // (lt * itemsize)
        bt = max(8, (bt // 8) * 8)
        if bt >= rows:
            bt = rows                             # full extent

    # --- make sure a 2-TC chip gets >= 2 grid steps when possible ------------
    if num_tc > 1 and pl.cdiv(rows, bt) * pl.cdiv(hw, lt) < 2:
        if rows > 8:
            bt = max(8, ((rows + 15) // 16) * 8)          # ~half the rows
        elif hw >= 256 and lt == hw:
            lt = max(128, ((hw // 2 + 127) // 128) * 128)  # ~half the lanes

    # --- mild even-grid preference on 2-TC chips (avoid 2:1 imbalance) -------
    if num_tc > 1 and bt < rows:
        gr = pl.cdiv(rows, bt)
        if gr > 1 and gr % 2 == 1:
            for cand in (bt + 8, bt - 8):
                if (8 <= cand < rows and pl.cdiv(rows, cand) % 2 == 0
                        and cand * lt * itemsize <= target_bytes * 3 // 2):
                    bt = cand
                    break

    return int(bt), int(lt)


# ----------------------------------------------------------------------------
# Forward.
# ----------------------------------------------------------------------------
def gridmask_forward(x, params, *, donate=False):
    """Apply GridMask with the given sampled params (None => identity)."""
    if params is None:
        return x
    n, c, h, w = x.shape
    rows, hw = n * c, h * w

    keep = gridmask_keep_mask_np(h, w, params["d"], params["l"],
                                 params["st_h"], params["st_w"])
    mask = jnp.asarray(keep.reshape(1, hw), dtype=x.dtype)  # 0/1 exact in bf16

    target_bytes, vmem_limit, num_tc = _chip_budget()
    itemsize = jnp.dtype(x.dtype).itemsize
    bt, lt = _choose_tiles(rows, hw, itemsize, target_bytes, num_tc)

    xr = x.reshape(rows, hw)
    out = pl.pallas_call(
        _gridmask_kernel,
        out_shape=jax.ShapeDtypeStruct((rows, hw), x.dtype),
        grid_spec=pl.GridSpec(
            grid=(pl.cdiv(rows, bt), pl.cdiv(hw, lt)),
            in_specs=[
                pl.BlockSpec((bt, lt), lambda r, l: (r, l)),   # x tile
                pl.BlockSpec((1, lt), lambda r, l: (0, l)),    # keep-mask slab
            ],
            out_specs=pl.BlockSpec((bt, lt), lambda r, l: (r, l)),
        ),
        compiler_params=pltpu.CompilerParams(
            dimension_semantics=("parallel", "parallel"),
            vmem_limit_bytes=vmem_limit),
        input_output_aliases=({0: 0} if donate else {}),
    )(xr, mask)
    return out.reshape(n, c, h, w)


# ----------------------------------------------------------------------------
# Self-test.
# ----------------------------------------------------------------------------
def _reference_forward_numpy(x_np, params):
    """Independent numpy re-implementation of the PyTorch forward body given
    the pre-sampled (d, l, st_h, st_w)."""
    n, c, h, w = x_np.shape
    d, l, st_h, st_w = params["d"], params["l"], params["st_h"], params["st_w"]
    hh, ww = int(1.5 * h), int(1.5 * w)
    m = np.ones((hh, ww), np.uint8)
    for i in range(hh // d):
        s = d * i + st_h
        t = min(s + l, hh)
        m[s:t, :] = 0
    for i in range(ww // d):
        s = d * i + st_w
        t = min(s + l, ww)
        m[:, s:t] = 0
    m = m[(hh - h) // 2:(hh - h) // 2 + h, (ww - w) // 2:(ww - w) // 2 + w]
    m = (1.0 - m.astype(x_np.dtype))          # mask = 1 - mask
    return x_np * m[None, None, :, :]


if __name__ == "__main__":
    np.random.seed(0)  # deterministic host-side GridMask randomness
    key = jax.random.PRNGKey(0)

    # --- case 1: small shape, params sampled exactly like the PyTorch forward
    n, c, h, w = 2, 4, 16, 16
    x = jax.random.normal(key, (n, c, h, w), dtype=jnp.float32)
    params = sample_gridmask_params(np.random, h, ratio=0.5, prob=0.7,
                                    training=True)
    assert params is not None  # seed 0: first rand() = 0.5488 < 0.7 -> applies
    y = jax.block_until_ready(gridmask_forward(x, params))
    y_ref = _reference_forward_numpy(np.asarray(x), params)
    np.testing.assert_allclose(np.asarray(y), y_ref, rtol=0, atol=0)

    # --- case 2: non-multiple-of-128 H*W (masked trailing lanes), fixed params
    n2, c2, h2, w2 = 2, 4, 20, 20
    x2 = jax.random.normal(jax.random.PRNGKey(1), (n2, c2, h2, w2),
                           dtype=jnp.float32)
    params2 = dict(d=7, l=4, st_h=2, st_w=5)
    y2 = jax.block_until_ready(gridmask_forward(x2, params2))
    y2_ref = _reference_forward_numpy(np.asarray(x2), params2)
    np.testing.assert_allclose(np.asarray(y2), y2_ref, rtol=0, atol=0)

    print("KERNEL_OK")
</pallas_src>

<mosaic_0001>
module attributes {stable_mosaic.version = 11 : i64} {
  func.func @_gridmask_kernel(%arg0: i32, %arg1: i32, %arg2: memref<8x256xf32, #tpu.memory_space<vmem>>, %arg3: memref<1x256xf32, #tpu.memory_space<vmem>>, %arg4: memref<8x256xf32, #tpu.memory_space<vmem>>) attributes {dimension_semantics = [#tpu.dimension_semantics<parallel>, #tpu.dimension_semantics<parallel>], iteration_bounds = array<i64: 1, 1>, scalar_prefetch = 0 : i64, scratch_operands = 0 : i64, tpu.core_type = #tpu.core_type<tc>, window_params = [{transform_indices = @transform_0, window_bounds = array<i64: 8, 256>}, {transform_indices = @transform_1, window_bounds = array<i64: 1, 256>}, {transform_indices = @transform_2, window_bounds = array<i64: 8, 256>}]} {
    %c0 = arith.constant 0 : index
    %c0_0 = arith.constant 0 : index
    %0 = vector.load %arg2[%c0, %c0_0] : memref<8x256xf32, #tpu.memory_space<vmem>>, vector<8x256xf32>
    %c0_1 = arith.constant 0 : index
    %c0_2 = arith.constant 0 : index
    %1 = vector.load %arg3[%c0_1, %c0_2] : memref<1x256xf32, #tpu.memory_space<vmem>>, vector<1x256xf32>
    %2 = vector.broadcast %1 : vector<1x256xf32> to vector<8x256xf32>
    %3 = arith.mulf %0, %2 : vector<8x256xf32>
    %c0_3 = arith.constant 0 : index
    %c0_4 = arith.constant 0 : index
    %4 = vector.load %arg4[%c0_3, %c0_4] : memref<8x256xf32, #tpu.memory_space<vmem>>, vector<8x256xf32>
    tpu.vector_store %arg4[%c0_3, %c0_4], %3 {strides = array<i32>} : memref<8x256xf32, #tpu.memory_space<vmem>>, vector<8x256xf32>,
    return
  }
  func.func @transform_0(%arg0: i32, %arg1: i32) -> (i32, i32) {
    %c0_i32 = arith.constant 0 : i32
    return %arg0, %arg1 : i32, i32
  }
  func.func @transform_1(%arg0: i32, %arg1: i32) -> (i32, i32) {
    %c0_i32 = arith.constant 0 : i32
    %c0_i32_0 = arith.constant 0 : i32
    return %c0_i32, %arg1 : i32, i32
  }
  func.func @transform_2(%arg0: i32, %arg1: i32) -> (i32, i32) {
    %c0_i32 = arith.constant 0 : i32
    return %arg0, %arg1 : i32, i32
  }
}

</mosaic_0001>

<bundles_post_ra>
// kernel: tpu_custom_call.1
= control target key start
LH: loop header
LB: loop body
LE: loop exit
PB: predicated region body
PF: predicated region fallthrough
CT: control target
= control target key end

     0   :  { %7 = vsyncpa [#allocation3], 0  ;;  %s199_s0 = inlined_call_operand.hbm [shape: f32[8,256], index: 0, kind: input, shape index: {}]   ;;  %s200_s1 = inlined_call_operand.hbm [shape: f32[1,256], index: 1, kind: input, shape index: {}]   ;;  %s201_s2 = inlined_call_operand.hbm [shape: f32[8,256], index: 2, kind: output, shape index: {}]  }
   0x1   :  { %8 = vsyncpa [#allocation6], 0 }
   0x2   :  { %9 = vsyncpa [#allocation4], 0  ;;  %s145_s9 = smov [#allocation2]   ;;  %s146_s11 = smov [#allocation5]  }
   0x3   :  { %s16_s10 = sshll.u32 %s145_s9, 4  ;;  %s26_s12 = sshll.u32 %s146_s11, 4  ;;  %s17_s10 = int_to_ptr.vmem [resolvable:$true] %s16_s10  ;;  %s27_s12 = int_to_ptr.vmem [resolvable:$true] %s26_s12 }
   0x4   :  { %s73_s15 = scalar_lea.hbm %s199_s0, 256 }
   0x5   :  { %p74_p0 = scmp.ne.s32.totalorder %s199_s0, %s73_s15  ;;  %p77_p1 = scmp.lt.u32.totalorder %s73_s15, %s199_s0 }
   0x7   :  { %p79_p2 = pnand %p77_p1, %p74_p0 }
   0x9   :  { %82 = shalt.err (!%p79_p2)
}
   0xa   :  { %s83_s20 = scalar_lea.vmem %s17_s10, 256  ;;  %p88_p4 = scmp.lt.s32.totalorder %s17_s10, %s17_s10 }
   0xb   :  { %p84_p3 = scmp.ne.s32.totalorder %s17_s10, %s83_s20  ;;  %p89_p5 = scmp.lt.s32.totalorder %s83_s20, %s83_s20 }
   0xd   :  { %p90_p6 = por %p89_p5, %p88_p4 }
   0xf   :  { %p91_p7 = pnand %p90_p6, %p84_p3 }
  0x11   :  { %94 = shalt.err (!%p91_p7)
}
  0x12   :  { %19 = dma.hbm_to_vmem [thread:$0]  %s199_s0, 256, %s17_s10, [#allocation3]  }
  0x13   :  { %s95_s25 = scalar_lea.hbm %s200_s1, 32 }
  0x14   :  { %p96_p8 = scmp.ne.s32.totalorder %s200_s1, %s95_s25  ;;  %p99_p9 = scmp.lt.u32.totalorder %s95_s25, %s200_s1 }
  0x16   :  { %p101_p10 = pnand %p99_p9, %p96_p8 }
  0x18   :  { %104 = shalt.err (!%p101_p10)
}
  0x19   :  { %s105_s30 = scalar_lea.vmem %s27_s12, 32  ;;  %p110_p12 = scmp.lt.s32.totalorder %s27_s12, %s27_s12 }
  0x1a   :  { %p106_p11 = scmp.ne.s32.totalorder %s27_s12, %s105_s30  ;;  %p111_p13 = scmp.lt.s32.totalorder %s105_s30, %s105_s30 }
  0x1c   :  { %p112_p0 = por %p111_p13, %p110_p12 }
  0x1e   :  { %p113_p1 = pnand %p112_p0, %p106_p11 }
  0x20   :  { %116 = shalt.err (!%p113_p1)
}
  0x21   :  { %29 = dma.hbm_to_vmem [thread:$0]  %s200_s1, 32, %s27_s12, [#allocation6]  }
  0x22   :  { %139 = dma.done.wait [#allocation3], 256  }
  0x23   :  { %140 = vsyncadd [#allocation3], 4294967040 }
  0x24   :  { %141 = dma.done.wait [#allocation6], 32  }
  0x25   :  { %142 = vsyncadd [#allocation6], 4294967264  ;;  %v40_v0 = vlaneseq  ;;  %v36_v4 = vld [vmem:[#allocation2] sm:$0xff]  ;;  %v38_v5 = vld [vmem:[#allocation5] sm:$0x3]  ;;  %s147_s4 = smov [#allocation7]  }
  0x26   :  { %v37_v6 = vld [vmem:[#allocation2 + $0x8] sm:$0xff]  ;;  %s60_s5 = sshll.u32 %s147_s4, 4  ;;  %s61_s5 = int_to_ptr.vmem [resolvable:$true] %s60_s5 }
  0x27   :  { %v41_v1 = vshrl.u32 %v40_v0, 7  ;;  %s117_s1 = scalar_lea.vmem %s61_s5, 256  ;;  %p122_p3 = scmp.lt.s32.totalorder %s61_s5, %s61_s5 }
  0x28   :  { %p118_p2 = scmp.ne.s32.totalorder %s61_s5, %s117_s1  ;;  %p123_p4 = scmp.lt.s32.totalorder %s117_s1, %s117_s1 }
  0x29   :  { %v42_v2 = vsub.s32 0, %v41_v1  ;;  %v46_v3 = vsub.s32 1, %v41_v1 }
  0x2a   :  { %p124_p5 = por %p123_p4, %p122_p3 }
  0x2b   :  { %v43_v7 = vrot.slane %v38_v5, %v42_v2  ;;  %v47_v8 = vrot.slane %v38_v5, %v46_v3 }
  0x2c   :  { %p125_p6 = pnand %p124_p5, %p118_p2 }
  0x2d   :  { %v50_v9 = vmul.f32 %v43_v7, %v36_v4  ;;  %v51_v10 = vmul.f32 %v47_v8, %v37_v6 }
  0x2f   :  { %52 = vst [vmem:[#allocation7] sm:$0xff] %v50_v9  ;;  %53 = vst [vmem:[#allocation7 + $0x8] sm:$0xff] %v51_v10 }
  0x30   :  { %128 = shalt.err (!%p125_p6)
}
  0x31   :  { %s129_s8 = scalar_lea.hbm %s201_s2, 256 }
  0x32   :  { %p130_p7 = scmp.ne.s32.totalorder %s201_s2, %s129_s8  ;;  %p133_p8 = scmp.lt.u32.totalorder %s129_s8, %s201_s2 }
  0x34   :  { %p135_p9 = pnand %p133_p8, %p130_p7 }
  0x36   :  { %138 = shalt.err (!%p135_p9)
}
  0x37   :  { %63 = dma.vmem_to_hbm [thread:$0]  %s61_s5, 256, %s201_s2, [#allocation4]  }
  0x38   :  { %143 = dma.done.wait [#allocation4], 256  }
  0x39   :  { %144 = vsyncadd [#allocation4], 4294967040 }
  0x3a   :  { %67 = vsyncpa [#allocation3], 1 }
  0x3b   :  { %68 = vsyncpa [#allocation6], 1 }
  0x3c   :  { %69 = vsyncpa [#allocation4], 1 }

</bundles_post_ra>
